<compile_context>
chip_gen: v6e
topology: v6e:2x2x1
jax: 0.10.0
libtpu: 0.0.40
codegen_flags: <defaults>
</compile_context>

<pallas_src>
import functools

import numpy as np
import jax
import jax.numpy as jnp
from jax.experimental import pallas as pl
from jax.experimental.pallas import tpu as pltpu


def _peg_kernel(body_ref, halo_ref, w_ref, b_ref, out_ref, xs_ref, *, k):
    """Depthwise k x k conv (+ folded bias & residual) for one (batch, C-tile, strip).

    body_ref: (Hs,   Wp, Cb)  padded-image rows [s*Hs, (s+1)*Hs)
    halo_ref: (k-1,  Wp, Cb)  padded-image rows [(s+1)*Hs, (s+1)*Hs + k-1)
    w_ref   : (k*k, Cb)       depthwise weights (row dy*k+dx), centre tap has +1.0
    b_ref   : (1, Cb)         bias
    out_ref : (Hs, W, Cb)     output strip
    xs_ref  : (Hs+k-1, Wp, Cb) VMEM scratch: assembled strip + bottom halo
    """
    Hs, W, Cb = out_ref.shape
    halo = k - 1

    # Assemble body + bottom halo into one contiguous slab so taps can slice across
    # the strip boundary with a single dynamic row index.  (Single copy pass; small
    # next to the 49-tap compute.)
    xs_ref[0:Hs, :, :] = body_ref[...]
    xs_ref[Hs:Hs + halo, :, :] = halo_ref[...]

    wt = w_ref[...].astype(jnp.float32)                              # (k*k, Cb)
    bias_row = jnp.broadcast_to(b_ref[...].astype(jnp.float32), (W, Cb))

    @pl.loop(0, Hs)
    def _(r):
        # Register-resident accumulators for one output row (~ceil(W/8) vregs each);
        # two partials (by dy parity) break the 49-deep serial add chain.
        acc_even = bias_row                       # bias folded into the init
        acc_odd = jnp.zeros((W, Cb), jnp.float32)
        accs = [acc_even, acc_odd]
        for dy in range(k):
            for dx in range(k):
                idx = dy * k + dx
                # Per-tap read straight from VMEM (dynamic row, static column window);
                # cast per-tap (not per-slab) so bf16 inputs stay bf16 in VMEM.
                tap = xs_ref[r + dy, pl.ds(dx, W), :].astype(jnp.float32)
                accs[dy % 2] = accs[dy % 2] + tap * wt[idx:idx + 1, :]
        # Exactly one store per output row (residual is inside wt's centre tap).
        out_ref[r] = (accs[0] + accs[1]).astype(out_ref.dtype)


def _pick_strip_height(H, W, Cb, k, itemsize, budget_bytes):
    """Strip height Hs (multiple of k-1) and strip count S covering H with little waste."""
    halo = k - 1
    p = k // 2
    Wp = W + 2 * p

    def vmem_bytes(hs):
        # double-buffered body + halo inputs, double-buffered output, scratch slab,
        # + ~1 MiB slack for weights/bias/row temporaries.
        return itemsize * Cb * (2 * hs * Wp + 2 * halo * Wp + 2 * hs * W
                                + (hs + halo) * Wp) + (1 << 20)

    hs_max = halo
    hs = halo
    while hs <= 120:
        if vmem_bytes(hs) <= budget_bytes:
            hs_max = hs
        hs += halo

    S = max(1, int(np.ceil(H / hs_max)))
    Hs = int(np.ceil(np.ceil(H / S) / halo)) * halo   # per-strip round-up -> low waste
    return Hs, S


def peg_forward(x, weight_oihw, bias, k=7):
    """PEG forward.  x: (B, N, C), weight_oihw: (C, 1, k, k), bias: (C,)."""
    assert k % 2 == 1 and k >= 3, "PEG kernel assumes odd k >= 3 (default k=7)"
    B, N, C = x.shape
    H = W = int(np.ceil(np.sqrt(N)))
    add_length = H * W - N
    p = k // 2
    halo = k - 1

    # Channel tile (lane axis): 128-lane blocks when possible, else full C.
    Cb = 128 if (C % 128 == 0) else C
    Cg = C // Cb
    itemsize = jnp.dtype(x.dtype).itemsize

    Hs, S = _pick_strip_height(H, W, Cb, k, itemsize, budget_bytes=20 * 1024 * 1024)
    # v7x megacore: keep >= 2 parallel grid blocks when the problem allows it.
    if B * Cg * S == 1 and H > halo:
        S = 2
        Hs = int(np.ceil(np.ceil(H / S) / halo)) * halo
    H2 = S * Hs
    Wp = W + 2 * p
    halo_mult = Hs // halo            # Hs is a multiple of (k-1)

    # Sequence wrap-pad, NHWC image view, zero halo + extra zero bottom rows (their
    # outputs are discarded).  XLA fuses these into one padded buffer for the kernel.
    x_tok = jnp.concatenate([x, x[:, :add_length, :]], axis=1) if add_length > 0 else x
    x_img = x_tok.reshape(B, H, W, C)
    x_pad = jnp.pad(x_img, ((0, 0), (p, p + (H2 - H)), (p, p), (0, 0)))

    # (C, 1, k, k) -> (k*k, C): channels on lanes, one row per tap.  Fold the residual
    # (identity) into the centre tap so the kernel has no separate residual add.
    w_flat = jnp.transpose(weight_oihw[:, 0, :, :], (1, 2, 0)).reshape(k * k, C)
    w_flat = w_flat.at[p * k + p].add(jnp.asarray(1.0, w_flat.dtype))
    b_2d = bias.reshape(1, C)

    kernel = functools.partial(_peg_kernel, k=k)

    out = pl.pallas_call(
        kernel,
        out_shape=jax.ShapeDtypeStruct((B, H2, W, C), x.dtype),
        grid=(B, Cg, S),
        in_specs=[
            # body strip: padded rows [s*Hs, (s+1)*Hs)
            pl.BlockSpec((None, Hs, Wp, Cb), lambda b, c, s: (b, s, 0, c)),
            # bottom halo: padded rows [(s+1)*Hs, (s+1)*Hs + k-1)
            pl.BlockSpec((None, halo, Wp, Cb),
                         lambda b, c, s: (b, (s + 1) * halo_mult, 0, c)),
            pl.BlockSpec((k * k, Cb), lambda b, c, s: (0, c)),
            pl.BlockSpec((1, Cb), lambda b, c, s: (0, c)),
        ],
        out_specs=pl.BlockSpec((None, Hs, W, Cb), lambda b, c, s: (b, s, 0, c)),
        scratch_shapes=[pltpu.VMEM((Hs + halo, Wp, Cb), x.dtype)],
        compiler_params=pltpu.CompilerParams(
            dimension_semantics=("parallel", "parallel", "parallel"),
            vmem_limit_bytes=40 * 1024 * 1024,
        ),
    )(x_pad, x_pad, w_flat, b_2d)

    out = out.reshape(B, H2 * W, C)[:, :N]
    return out


def peg_reference(x, weight_oihw, bias, k=7):
    """Pure-JAX reference (mirrors the PyTorch forward, NCHW depthwise conv)."""
    B, N, C = x.shape
    H = W = int(np.ceil(np.sqrt(N)))
    add_length = H * W - N
    x_tok = jnp.concatenate([x, x[:, :add_length, :]], axis=1)
    cnn = jnp.transpose(x_tok, (0, 2, 1)).reshape(B, C, H, W)
    conv = jax.lax.conv_general_dilated(
        cnn, weight_oihw, window_strides=(1, 1),
        padding=[(k // 2, k // 2), (k // 2, k // 2)],
        dimension_numbers=("NCHW", "OIHW", "NCHW"),
        feature_group_count=C)
    out = conv + bias[None, :, None, None] + cnn
    out = out.reshape(B, C, H * W).transpose(0, 2, 1)
    if add_length > 0:
        out = out[:, :-add_length]
    return out


if __name__ == "__main__":
    # Small shapes consistent with the module: B=2 bags, N=13 tokens, dim=C=128, k=7.
    B, N, C, K = 2, 13, 128, 7

    key = jax.random.PRNGKey(0)
    kx, kw, kb = jax.random.split(key, 3)
    x = jax.random.normal(kx, (B, N, C), dtype=jnp.float32)
    # Conv2d(dim, dim, k, groups=dim, bias=True): weight (dim, 1, k, k), bias (dim,)
    weight = jax.random.normal(kw, (C, 1, K, K), dtype=jnp.float32) * 0.05
    bias = jax.random.normal(kb, (C,), dtype=jnp.float32) * 0.05

    out = jax.block_until_ready(peg_forward(x, weight, bias, k=K))

    ref = peg_reference(x, weight, bias, k=K)
    assert out.shape == (B, N, C), out.shape
    np.testing.assert_allclose(np.asarray(out), np.asarray(ref),
                               rtol=1e-4, atol=1e-4)

    print("KERNEL_OK")
</pallas_src>

<mosaic_0001>
module attributes {stable_mosaic.version = 11 : i64} {
  func.func @_peg_kernel(%arg0: i32, %arg1: i32, %arg2: i32, %arg3: memref<1x6x10x128xf32, #tpu.memory_space<vmem>>, %arg4: memref<1x6x10x128xf32, #tpu.memory_space<vmem>>, %arg5: memref<49x128xf32, #tpu.memory_space<vmem>>, %arg6: memref<1x128xf32, #tpu.memory_space<vmem>>, %arg7: memref<1x6x4x128xf32, #tpu.memory_space<vmem>>, %arg8: memref<12x10x128xf32, #tpu.memory_space<vmem>>) attributes {dimension_semantics = [#tpu.dimension_semantics<parallel>, #tpu.dimension_semantics<parallel>, #tpu.dimension_semantics<parallel>], iteration_bounds = array<i64: 2, 1, 1>, scalar_prefetch = 0 : i64, scratch_operands = 1 : i64, tpu.core_type = #tpu.core_type<tc>, window_params = [{transform_indices = @transform_0, window_bounds = array<i64: 1, 6, 10, 128>}, {transform_indices = @transform_1, window_bounds = array<i64: 1, 6, 10, 128>}, {transform_indices = @transform_2, window_bounds = array<i64: 49, 128>}, {transform_indices = @transform_3, window_bounds = array<i64: 1, 128>}, {transform_indices = @transform_4, window_bounds = array<i64: 1, 6, 4, 128>}]} {
    %c0 = arith.constant 0 : index
    %c0_0 = arith.constant 0 : index
    %c0_1 = arith.constant 0 : index
    %c0_2 = arith.constant 0 : index
    %0 = vector.load %arg3[%c0, %c0_0, %c0_1, %c0_2] : memref<1x6x10x128xf32, #tpu.memory_space<vmem>>, vector<1x6x10x128xf32>
    %1 = vector.shape_cast %0 : vector<1x6x10x128xf32> to vector<6x10x128xf32>
    %c0_3 = arith.constant 0 : index
    %c0_4 = arith.constant 0 : index
    %c0_5 = arith.constant 0 : index
    %2 = vector.load %arg8[%c0_3, %c0_4, %c0_5] : memref<12x10x128xf32, #tpu.memory_space<vmem>>, vector<6x10x128xf32>
    tpu.vector_store %arg8[%c0_3, %c0_4, %c0_5], %1 {strides = array<i32>} : memref<12x10x128xf32, #tpu.memory_space<vmem>>, vector<6x10x128xf32>,
    %c0_6 = arith.constant 0 : index
    %c0_7 = arith.constant 0 : index
    %c0_8 = arith.constant 0 : index
    %c0_9 = arith.constant 0 : index
    %3 = vector.load %arg4[%c0_6, %c0_7, %c0_8, %c0_9] : memref<1x6x10x128xf32, #tpu.memory_space<vmem>>, vector<1x6x10x128xf32>
    %4 = vector.shape_cast %3 : vector<1x6x10x128xf32> to vector<6x10x128xf32>
    %c6 = arith.constant 6 : index
    %c0_10 = arith.constant 0 : index
    %c0_11 = arith.constant 0 : index
    %5 = vector.load %arg8[%c6, %c0_10, %c0_11] : memref<12x10x128xf32, #tpu.memory_space<vmem>>, vector<6x10x128xf32>
    tpu.vector_store %arg8[%c6, %c0_10, %c0_11], %4 {strides = array<i32>} : memref<12x10x128xf32, #tpu.memory_space<vmem>>, vector<6x10x128xf32>,
    %c0_12 = arith.constant 0 : index
    %c0_13 = arith.constant 0 : index
    %6 = vector.load %arg5[%c0_12, %c0_13] : memref<49x128xf32, #tpu.memory_space<vmem>>, vector<49x128xf32>
    %c0_14 = arith.constant 0 : index
    %c0_15 = arith.constant 0 : index
    %7 = vector.load %arg6[%c0_14, %c0_15] : memref<1x128xf32, #tpu.memory_space<vmem>>, vector<1x128xf32>
    %8 = vector.shape_cast %7 : vector<1x128xf32> to vector<1x128xf32>
    %9 = vector.broadcast %8 : vector<1x128xf32> to vector<4x128xf32>
    %c0_i32 = arith.constant 0 : i32
    %c6_i32 = arith.constant 6 : i32
    %10 = arith.addi %c0_i32, %c6_i32 : i32
    %c1_i32 = arith.constant 1 : i32
    scf.for %arg9 = %c0_i32 to %10 step %c1_i32  : i32 {
      %c1_i32_17 = arith.constant 1 : i32
      %11 = arith.muli %arg9, %c1_i32_17 : i32
      %c0_i32_18 = arith.constant 0 : i32
      %12 = arith.addi %c0_i32_18, %11 : i32
      %cst = arith.constant 0.000000e+00 : f32
      %13 = vector.broadcast %cst : f32 to vector<4x128xf32>
      %c0_i32_19 = arith.constant 0 : i32
      %14 = arith.addi %12, %c0_i32_19 : i32
      %15 = arith.index_cast %14 : i32 to index
      %c0_20 = arith.constant 0 : index
      %c0_21 = arith.constant 0 : index
      %16 = vector.load %arg8[%15, %c0_20, %c0_21] : memref<12x10x128xf32, #tpu.memory_space<vmem>>, vector<1x4x128xf32>
      %17 = vector.shape_cast %16 : vector<1x4x128xf32> to vector<4x128xf32>
      %18 = vector.extract_strided_slice %6 {offsets = [0, 0], sizes = [1, 128], strides = [1, 1]} : vector<49x128xf32> to vector<1x128xf32>
      %19 = vector.broadcast %18 : vector<1x128xf32> to vector<4x128xf32>
      %20 = arith.mulf %17, %19 : vector<4x128xf32>
      %21 = arith.addf %9, %20 : vector<4x128xf32>
      %c0_i32_22 = arith.constant 0 : i32
      %22 = arith.addi %12, %c0_i32_22 : i32
      %23 = arith.index_cast %22 : i32 to index
      %c1 = arith.constant 1 : index
      %c0_23 = arith.constant 0 : index
      %24 = vector.load %arg8[%23, %c1, %c0_23] : memref<12x10x128xf32, #tpu.memory_space<vmem>>, vector<1x4x128xf32>
      %25 = vector.shape_cast %24 : vector<1x4x128xf32> to vector<4x128xf32>
      %26 = vector.extract_strided_slice %6 {offsets = [1, 0], sizes = [1, 128], strides = [1, 1]} : vector<49x128xf32> to vector<1x128xf32>
      %27 = vector.broadcast %26 : vector<1x128xf32> to vector<4x128xf32>
      %28 = arith.mulf %25, %27 : vector<4x128xf32>
      %29 = arith.addf %21, %28 : vector<4x128xf32>
      %c0_i32_24 = arith.constant 0 : i32
      %30 = arith.addi %12, %c0_i32_24 : i32
      %31 = arith.index_cast %30 : i32 to index
      %c2 = arith.constant 2 : index
      %c0_25 = arith.constant 0 : index
      %32 = vector.load %arg8[%31, %c2, %c0_25] : memref<12x10x128xf32, #tpu.memory_space<vmem>>, vector<1x4x128xf32>
      %33 = vector.shape_cast %32 : vector<1x4x128xf32> to vector<4x128xf32>
      %34 = vector.extract_strided_slice %6 {offsets = [2, 0], sizes = [1, 128], strides = [1, 1]} : vector<49x128xf32> to vector<1x128xf32>
      %35 = vector.broadcast %34 : vector<1x128xf32> to vector<4x128xf32>
      %36 = arith.mulf %33, %35 : vector<4x128xf32>
      %37 = arith.addf %29, %36 : vector<4x128xf32>
      %c0_i32_26 = arith.constant 0 : i32
      %38 = arith.addi %12, %c0_i32_26 : i32
      %39 = arith.index_cast %38 : i32 to index
      %c3 = arith.constant 3 : index
      %c0_27 = arith.constant 0 : index
      %40 = vector.load %arg8[%39, %c3, %c0_27] : memref<12x10x128xf32, #tpu.memory_space<vmem>>, vector<1x4x128xf32>
      %41 = vector.shape_cast %40 : vector<1x4x128xf32> to vector<4x128xf32>
      %42 = vector.extract_strided_slice %6 {offsets = [3, 0], sizes = [1, 128], strides = [1, 1]} : vector<49x128xf32> to vector<1x128xf32>
      %43 = vector.broadcast %42 : vector<1x128xf32> to vector<4x128xf32>
      %44 = arith.mulf %41, %43 : vector<4x128xf32>
      %45 = arith.addf %37, %44 : vector<4x128xf32>
      %c0_i32_28 = arith.constant 0 : i32
      %46 = arith.addi %12, %c0_i32_28 : i32
      %47 = arith.index_cast %46 : i32 to index
      %c4 = arith.constant 4 : index
      %c0_29 = arith.constant 0 : index
      %48 = vector.load %arg8[%47, %c4, %c0_29] : memref<12x10x128xf32, #tpu.memory_space<vmem>>, vector<1x4x128xf32>
      %49 = vector.shape_cast %48 : vector<1x4x128xf32> to vector<4x128xf32>
      %50 = vector.extract_strided_slice %6 {offsets = [4, 0], sizes = [1, 128], strides = [1, 1]} : vector<49x128xf32> to vector<1x128xf32>
      %51 = vector.broadcast %50 : vector<1x128xf32> to vector<4x128xf32>
      %52 = arith.mulf %49, %51 : vector<4x128xf32>
      %53 = arith.addf %45, %52 : vector<4x128xf32>
      %c0_i32_30 = arith.constant 0 : i32
      %54 = arith.addi %12, %c0_i32_30 : i32
      %55 = arith.index_cast %54 : i32 to index
      %c5 = arith.constant 5 : index
      %c0_31 = arith.constant 0 : index
      %56 = vector.load %arg8[%55, %c5, %c0_31] : memref<12x10x128xf32, #tpu.memory_space<vmem>>, vector<1x4x128xf32>
      %57 = vector.shape_cast %56 : vector<1x4x128xf32> to vector<4x128xf32>
      %58 = vector.extract_strided_slice %6 {offsets = [5, 0], sizes = [1, 128], strides = [1, 1]} : vector<49x128xf32> to vector<1x128xf32>
      %59 = vector.broadcast %58 : vector<1x128xf32> to vector<4x128xf32>
      %60 = arith.mulf %57, %59 : vector<4x128xf32>
      %61 = arith.addf %53, %60 : vector<4x128xf32>
      %c0_i32_32 = arith.constant 0 : i32
      %62 = arith.addi %12, %c0_i32_32 : i32
      %63 = arith.index_cast %62 : i32 to index
      %c6_33 = arith.constant 6 : index
      %c0_34 = arith.constant 0 : index
      %64 = vector.load %arg8[%63, %c6_33, %c0_34] : memref<12x10x128xf32, #tpu.memory_space<vmem>>, vector<1x4x128xf32>
      %65 = vector.shape_cast %64 : vector<1x4x128xf32> to vector<4x128xf32>
      %66 = vector.extract_strided_slice %6 {offsets = [6, 0], sizes = [1, 128], strides = [1, 1]} : vector<49x128xf32> to vector<1x128xf32>
      %67 = vector.broadcast %66 : vector<1x128xf32> to vector<4x128xf32>
      %68 = arith.mulf %65, %67 : vector<4x128xf32>
      %69 = arith.addf %61, %68 : vector<4x128xf32>
      %c1_i32_35 = arith.constant 1 : i32
      %70 = arith.addi %12, %c1_i32_35 : i32
      %71 = arith.index_cast %70 : i32 to index
      %c0_36 = arith.constant 0 : index
      %c0_37 = arith.constant 0 : index
      %72 = vector.load %arg8[%71, %c0_36, %c0_37] : memref<12x10x128xf32, #tpu.memory_space<vmem>>, vector<1x4x128xf32>
      %73 = vector.shape_cast %72 : vector<1x4x128xf32> to vector<4x128xf32>
      %74 = vector.extract_strided_slice %6 {offsets = [7, 0], sizes = [1, 128], strides = [1, 1]} : vector<49x128xf32> to vector<1x128xf32>
      %75 = vector.broadcast %74 : vector<1x128xf32> to vector<4x128xf32>
      %76 = arith.mulf %73, %75 : vector<4x128xf32>
      %77 = arith.addf %13, %76 : vector<4x128xf32>
      %c1_i32_38 = arith.constant 1 : i32
      %78 = arith.addi %12, %c1_i32_38 : i32
      %79 = arith.index_cast %78 : i32 to index
      %c1_39 = arith.constant 1 : index
      %c0_40 = arith.constant 0 : index
      %80 = vector.load %arg8[%79, %c1_39, %c0_40] : memref<12x10x128xf32, #tpu.memory_space<vmem>>, vector<1x4x128xf32>
      %81 = vector.shape_cast %80 : vector<1x4x128xf32> to vector<4x128xf32>
      %82 = vector.extract_strided_slice %6 {offsets = [8, 0], sizes = [1, 128], strides = [1, 1]} : vector<49x128xf32> to vector<1x128xf32>
      %83 = vector.broadcast %82 : vector<1x128xf32> to vector<4x128xf32>
      %84 = arith.mulf %81, %83 : vector<4x128xf32>
      %85 = arith.addf %77, %84 : vector<4x128xf32>
      %c1_i32_41 = arith.constant 1 : i32
      %86 = arith.addi %12, %c1_i32_41 : i32
      %87 = arith.index_cast %86 : i32 to index
      %c2_42 = arith.constant 2 : index
      %c0_43 = arith.constant 0 : index
      %88 = vector.load %arg8[%87, %c2_42, %c0_43] : memref<12x10x128xf32, #tpu.memory_space<vmem>>, vector<1x4x128xf32>
      %89 = vector.shape_cast %88 : vector<1x4x128xf32> to vector<4x128xf32>
      %90 = vector.extract_strided_slice %6 {offsets = [9, 0], sizes = [1, 128], strides = [1, 1]} : vector<49x128xf32> to vector<1x128xf32>
      %91 = vector.broadcast %90 : vector<1x128xf32> to vector<4x128xf32>
      %92 = arith.mulf %89, %91 : vector<4x128xf32>
      %93 = arith.addf %85, %92 : vector<4x128xf32>
      %c1_i32_44 = arith.constant 1 : i32
      %94 = arith.addi %12, %c1_i32_44 : i32
      %95 = arith.index_cast %94 : i32 to index
      %c3_45 = arith.constant 3 : index
      %c0_46 = arith.constant 0 : index
      %96 = vector.load %arg8[%95, %c3_45, %c0_46] : memref<12x10x128xf32, #tpu.memory_space<vmem>>, vector<1x4x128xf32>
      %97 = vector.shape_cast %96 : vector<1x4x128xf32> to vector<4x128xf32>
      %98 = vector.extract_strided_slice %6 {offsets = [10, 0], sizes = [1, 128], strides = [1, 1]} : vector<49x128xf32> to vector<1x128xf32>
      %99 = vector.broadcast %98 : vector<1x128xf32> to vector<4x128xf32>
      %100 = arith.mulf %97, %99 : vector<4x128xf32>
      %101 = arith.addf %93, %100 : vector<4x128xf32>
      %c1_i32_47 = arith.constant 1 : i32
      %102 = arith.addi %12, %c1_i32_47 : i32
      %103 = arith.index_cast %102 : i32 to index
      %c4_48 = arith.constant 4 : index
      %c0_49 = arith.constant 0 : index
      %104 = vector.load %arg8[%103, %c4_48, %c0_49] : memref<12x10x128xf32, #tpu.memory_space<vmem>>, vector<1x4x128xf32>
      %105 = vector.shape_cast %104 : vector<1x4x128xf32> to vector<4x128xf32>
      %106 = vector.extract_strided_slice %6 {offsets = [11, 0], sizes = [1, 128], strides = [1, 1]} : vector<49x128xf32> to vector<1x128xf32>
      %107 = vector.broadcast %106 : vector<1x128xf32> to vector<4x128xf32>
      %108 = arith.mulf %105, %107 : vector<4x128xf32>
      %109 = arith.addf %101, %108 : vector<4x128xf32>
      %c1_i32_50 = arith.constant 1 : i32
      %110 = arith.addi %12, %c1_i32_50 : i32
      %111 = arith.index_cast %110 : i32 to index
      %c5_51 = arith.constant 5 : index
      %c0_52 = arith.constant 0 : index
      %112 = vector.load %arg8[%111, %c5_51, %c0_52] : memref<12x10x128xf32, #tpu.memory_space<vmem>>, vector<1x4x128xf32>
      %113 = vector.shape_cast %112 : vector<1x4x128xf32> to vector<4x128xf32>
      %114 = vector.extract_strided_slice %6 {offsets = [12, 0], sizes = [1, 128], strides = [1, 1]} : vector<49x128xf32> to vector<1x128xf32>
      %115 = vector.broadcast %114 : vector<1x128xf32> to vector<4x128xf32>
      %116 = arith.mulf %113, %115 : vector<4x128xf32>
      %117 = arith.addf %109, %116 : vector<4x128xf32>
      %c1_i32_53 = arith.constant 1 : i32
      %118 = arith.addi %12, %c1_i32_53 : i32
      %119 = arith.index_cast %118 : i32 to index
      %c6_54 = arith.constant 6 : index
      %c0_55 = arith.constant 0 : index
      %120 = vector.load %arg8[%119, %c6_54, %c0_55] : memref<12x10x128xf32, #tpu.memory_space<vmem>>, vector<1x4x128xf32>
      %121 = vector.shape_cast %120 : vector<1x4x128xf32> to vector<4x128xf32>
      %122 = vector.extract_strided_slice %6 {offsets = [13, 0], sizes = [1, 128], strides = [1, 1]} : vector<49x128xf32> to vector<1x128xf32>
      %123 = vector.broadcast %122 : vector<1x128xf32> to vector<4x128xf32>
      %124 = arith.mulf %121, %123 : vector<4x128xf32>
      %125 = arith.addf %117, %124 : vector<4x128xf32>
      %c2_i32 = arith.constant 2 : i32
      %126 = arith.addi %12, %c2_i32 : i32
      %127 = arith.index_cast %126 : i32 to index
      %c0_56 = arith.constant 0 : index
      %c0_57 = arith.constant 0 : index
      %128 = vector.load %arg8[%127, %c0_56, %c0_57] : memref<12x10x128xf32, #tpu.memory_space<vmem>>, vector<1x4x128xf32>
      %129 = vector.shape_cast %128 : vector<1x4x128xf32> to vector<4x128xf32>
      %130 = vector.extract_strided_slice %6 {offsets = [14, 0], sizes = [1, 128], strides = [1, 1]} : vector<49x128xf32> to vector<1x128xf32>
      %131 = vector.broadcast %130 : vector<1x128xf32> to vector<4x128xf32>
      %132 = arith.mulf %129, %131 : vector<4x128xf32>
      %133 = arith.addf %69, %132 : vector<4x128xf32>
      %c2_i32_58 = arith.constant 2 : i32
      %134 = arith.addi %12, %c2_i32_58 : i32
      %135 = arith.index_cast %134 : i32 to index
      %c1_59 = arith.constant 1 : index
      %c0_60 = arith.constant 0 : index
      %136 = vector.load %arg8[%135, %c1_59, %c0_60] : memref<12x10x128xf32, #tpu.memory_space<vmem>>, vector<1x4x128xf32>
      %137 = vector.shape_cast %136 : vector<1x4x128xf32> to vector<4x128xf32>
      %138 = vector.extract_strided_slice %6 {offsets = [15, 0], sizes = [1, 128], strides = [1, 1]} : vector<49x128xf32> to vector<1x128xf32>
      %139 = vector.broadcast %138 : vector<1x128xf32> to vector<4x128xf32>
      %140 = arith.mulf %137, %139 : vector<4x128xf32>
      %141 = arith.addf %133, %140 : vector<4x128xf32>
      %c2_i32_61 = arith.constant 2 : i32
      %142 = arith.addi %12, %c2_i32_61 : i32
      %143 = arith.index_cast %142 : i32 to index
      %c2_62 = arith.constant 2 : index
      %c0_63 = arith.constant 0 : index
      %144 = vector.load %arg8[%143, %c2_62, %c0_63] : memref<12x10x128xf32, #tpu.memory_space<vmem>>, vector<1x4x128xf32>
      %145 = vector.shape_cast %144 : vector<1x4x128xf32> to vector<4x128xf32>
      %146 = vector.extract_strided_slice %6 {offsets = [16, 0], sizes = [1, 128], strides = [1, 1]} : vector<49x128xf32> to vector<1x128xf32>
      %147 = vector.broadcast %146 : vector<1x128xf32> to vector<4x128xf32>
      %148 = arith.mulf %145, %147 : vector<4x128xf32>
      %149 = arith.addf %141, %148 : vector<4x128xf32>
      %c2_i32_64 = arith.constant 2 : i32
      %150 = arith.addi %12, %c2_i32_64 : i32
      %151 = arith.index_cast %150 : i32 to index
      %c3_65 = arith.constant 3 : index
      %c0_66 = arith.constant 0 : index
      %152 = vector.load %arg8[%151, %c3_65, %c0_66] : memref<12x10x128xf32, #tpu.memory_space<vmem>>, vector<1x4x128xf32>
      %153 = vector.shape_cast %152 : vector<1x4x128xf32> to vector<4x128xf32>
      %154 = vector.extract_strided_slice %6 {offsets = [17, 0], sizes = [1, 128], strides = [1, 1]} : vector<49x128xf32> to vector<1x128xf32>
      %155 = vector.broadcast %154 : vector<1x128xf32> to vector<4x128xf32>
      %156 = arith.mulf %153, %155 : vector<4x128xf32>
      %157 = arith.addf %149, %156 : vector<4x128xf32>
      %c2_i32_67 = arith.constant 2 : i32
      %158 = arith.addi %12, %c2_i32_67 : i32
      %159 = arith.index_cast %158 : i32 to index
      %c4_68 = arith.constant 4 : index
      %c0_69 = arith.constant 0 : index
      %160 = vector.load %arg8[%159, %c4_68, %c0_69] : memref<12x10x128xf32, #tpu.memory_space<vmem>>, vector<1x4x128xf32>
      %161 = vector.shape_cast %160 : vector<1x4x128xf32> to vector<4x128xf32>
      %162 = vector.extract_strided_slice %6 {offsets = [18, 0], sizes = [1, 128], strides = [1, 1]} : vector<49x128xf32> to vector<1x128xf32>
      %163 = vector.broadcast %162 : vector<1x128xf32> to vector<4x128xf32>
      %164 = arith.mulf %161, %163 : vector<4x128xf32>
      %165 = arith.addf %157, %164 : vector<4x128xf32>
      %c2_i32_70 = arith.constant 2 : i32
      %166 = arith.addi %12, %c2_i32_70 : i32
      %167 = arith.index_cast %166 : i32 to index
      %c5_71 = arith.constant 5 : index
      %c0_72 = arith.constant 0 : index
      %168 = vector.load %arg8[%167, %c5_71, %c0_72] : memref<12x10x128xf32, #tpu.memory_space<vmem>>, vector<1x4x128xf32>
      %169 = vector.shape_cast %168 : vector<1x4x128xf32> to vector<4x128xf32>
      %170 = vector.extract_strided_slice %6 {offsets = [19, 0], sizes = [1, 128], strides = [1, 1]} : vector<49x128xf32> to vector<1x128xf32>
      %171 = vector.broadcast %170 : vector<1x128xf32> to vector<4x128xf32>
      %172 = arith.mulf %169, %171 : vector<4x128xf32>
      %173 = arith.addf %165, %172 : vector<4x128xf32>
      %c2_i32_73 = arith.constant 2 : i32
      %174 = arith.addi %12, %c2_i32_73 : i32
      %175 = arith.index_cast %174 : i32 to index
      %c6_74 = arith.constant 6 : index
      %c0_75 = arith.constant 0 : index
      %176 = vector.load %arg8[%175, %c6_74, %c0_75] : memref<12x10x128xf32, #tpu.memory_space<vmem>>, vector<1x4x128xf32>
      %177 = vector.shape_cast %176 : vector<1x4x128xf32> to vector<4x128xf32>
      %178 = vector.extract_strided_slice %6 {offsets = [20, 0], sizes = [1, 128], strides = [1, 1]} : vector<49x128xf32> to vector<1x128xf32>
      %179 = vector.broadcast %178 : vector<1x128xf32> to vector<4x128xf32>
      %180 = arith.mulf %177, %179 : vector<4x128xf32>
      %181 = arith.addf %173, %180 : vector<4x128xf32>
      %c3_i32 = arith.constant 3 : i32
      %182 = arith.addi %12, %c3_i32 : i32
      %183 = arith.index_cast %182 : i32 to index
      %c0_76 = arith.constant 0 : index
      %c0_77 = arith.constant 0 : index
      %184 = vector.load %arg8[%183, %c0_76, %c0_77] : memref<12x10x128xf32, #tpu.memory_space<vmem>>, vector<1x4x128xf32>
      %185 = vector.shape_cast %184 : vector<1x4x128xf32> to vector<4x128xf32>
      %186 = vector.extract_strided_slice %6 {offsets = [21, 0], sizes = [1, 128], strides = [1, 1]} : vector<49x128xf32> to vector<1x128xf32>
      %187 = vector.broadcast %186 : vector<1x128xf32> to vector<4x128xf32>
      %188 = arith.mulf %185, %187 : vector<4x128xf32>
      %189 = arith.addf %125, %188 : vector<4x128xf32>
      %c3_i32_78 = arith.constant 3 : i32
      %190 = arith.addi %12, %c3_i32_78 : i32
      %191 = arith.index_cast %190 : i32 to index
      %c1_79 = arith.constant 1 : index
      %c0_80 = arith.constant 0 : index
      %192 = vector.load %arg8[%191, %c1_79, %c0_80] : memref<12x10x128xf32, #tpu.memory_space<vmem>>, vector<1x4x128xf32>
      %193 = vector.shape_cast %192 : vector<1x4x128xf32> to vector<4x128xf32>
      %194 = vector.extract_strided_slice %6 {offsets = [22, 0], sizes = [1, 128], strides = [1, 1]} : vector<49x128xf32> to vector<1x128xf32>
      %195 = vector.broadcast %194 : vector<1x128xf32> to vector<4x128xf32>
      %196 = arith.mulf %193, %195 : vector<4x128xf32>
      %197 = arith.addf %189, %196 : vector<4x128xf32>
      %c3_i32_81 = arith.constant 3 : i32
      %198 = arith.addi %12, %c3_i32_81 : i32
      %199 = arith.index_cast %198 : i32 to index
      %c2_82 = arith.constant 2 : index
      %c0_83 = arith.constant 0 : index
      %200 = vector.load %arg8[%199, %c2_82, %c0_83] : memref<12x10x128xf32, #tpu.memory_space<vmem>>, vector<1x4x128xf32>
      %201 = vector.shape_cast %200 : vector<1x4x128xf32> to vector<4x128xf32>
      %202 = vector.extract_strided_slice %6 {offsets = [23, 0], sizes = [1, 128], strides = [1, 1]} : vector<49x128xf32> to vector<1x128xf32>
      %203 = vector.broadcast %202 : vector<1x128xf32> to vector<4x128xf32>
      %204 = arith.mulf %201, %203 : vector<4x128xf32>
      %205 = arith.addf %197, %204 : vector<4x128xf32>
      %c3_i32_84 = arith.constant 3 : i32
      %206 = arith.addi %12, %c3_i32_84 : i32
      %207 = arith.index_cast %206 : i32 to index
      %c3_85 = arith.constant 3 : index
      %c0_86 = arith.constant 0 : index
      %208 = vector.load %arg8[%207, %c3_85, %c0_86] : memref<12x10x128xf32, #tpu.memory_space<vmem>>, vector<1x4x128xf32>
      %209 = vector.shape_cast %208 : vector<1x4x128xf32> to vector<4x128xf32>
      %210 = vector.extract_strided_slice %6 {offsets = [24, 0], sizes = [1, 128], strides = [1, 1]} : vector<49x128xf32> to vector<1x128xf32>
      %211 = vector.broadcast %210 : vector<1x128xf32> to vector<4x128xf32>
      %212 = arith.mulf %209, %211 : vector<4x128xf32>
      %213 = arith.addf %205, %212 : vector<4x128xf32>
      %c3_i32_87 = arith.constant 3 : i32
      %214 = arith.addi %12, %c3_i32_87 : i32
      %215 = arith.index_cast %214 : i32 to index
      %c4_88 = arith.constant 4 : index
      %c0_89 = arith.constant 0 : index
      %216 = vector.load %arg8[%215, %c4_88, %c0_89] : memref<12x10x128xf32, #tpu.memory_space<vmem>>, vector<1x4x128xf32>
      %217 = vector.shape_cast %216 : vector<1x4x128xf32> to vector<4x128xf32>
      %218 = vector.extract_strided_slice %6 {offsets = [25, 0], sizes = [1, 128], strides = [1, 1]} : vector<49x128xf32> to vector<1x128xf32>
      %219 = vector.broadcast %218 : vector<1x128xf32> to vector<4x128xf32>
      %220 = arith.mulf %217, %219 : vector<4x128xf32>
      %221 = arith.addf %213, %220 : vector<4x128xf32>
      %c3_i32_90 = arith.constant 3 : i32
      %222 = arith.addi %12, %c3_i32_90 : i32
      %223 = arith.index_cast %222 : i32 to index
      %c5_91 = arith.constant 5 : index
      %c0_92 = arith.constant 0 : index
      %224 = vector.load %arg8[%223, %c5_91, %c0_92] : memref<12x10x128xf32, #tpu.memory_space<vmem>>, vector<1x4x128xf32>
      %225 = vector.shape_cast %224 : vector<1x4x128xf32> to vector<4x128xf32>
      %226 = vector.extract_strided_slice %6 {offsets = [26, 0], sizes = [1, 128], strides = [1, 1]} : vector<49x128xf32> to vector<1x128xf32>
      %227 = vector.broadcast %226 : vector<1x128xf32> to vector<4x128xf32>
      %228 = arith.mulf %225, %227 : vector<4x128xf32>
      %229 = arith.addf %221, %228 : vector<4x128xf32>
      %c3_i32_93 = arith.constant 3 : i32
      %230 = arith.addi %12, %c3_i32_93 : i32
      %231 = arith.index_cast %230 : i32 to index
      %c6_94 = arith.constant 6 : index
      %c0_95 = arith.constant 0 : index
      %232 = vector.load %arg8[%231, %c6_94, %c0_95] : memref<12x10x128xf32, #tpu.memory_space<vmem>>, vector<1x4x128xf32>
      %233 = vector.shape_cast %232 : vector<1x4x128xf32> to vector<4x128xf32>
      %234 = vector.extract_strided_slice %6 {offsets = [27, 0], sizes = [1, 128], strides = [1, 1]} : vector<49x128xf32> to vector<1x128xf32>
      %235 = vector.broadcast %234 : vector<1x128xf32> to vector<4x128xf32>
      %236 = arith.mulf %233, %235 : vector<4x128xf32>
      %237 = arith.addf %229, %236 : vector<4x128xf32>
      %c4_i32 = arith.constant 4 : i32
      %238 = arith.addi %12, %c4_i32 : i32
      %239 = arith.index_cast %238 : i32 to index
      %c0_96 = arith.constant 0 : index
      %c0_97 = arith.constant 0 : index
      %240 = vector.load %arg8[%239, %c0_96, %c0_97] : memref<12x10x128xf32, #tpu.memory_space<vmem>>, vector<1x4x128xf32>
      %241 = vector.shape_cast %240 : vector<1x4x128xf32> to vector<4x128xf32>
      %242 = vector.extract_strided_slice %6 {offsets = [28, 0], sizes = [1, 128], strides = [1, 1]} : vector<49x128xf32> to vector<1x128xf32>
      %243 = vector.broadcast %242 : vector<1x128xf32> to vector<4x128xf32>
      %244 = arith.mulf %241, %243 : vector<4x128xf32>
      %245 = arith.addf %181, %244 : vector<4x128xf32>
      %c4_i32_98 = arith.constant 4 : i32
      %246 = arith.addi %12, %c4_i32_98 : i32
      %247 = arith.index_cast %246 : i32 to index
      %c1_99 = arith.constant 1 : index
      %c0_100 = arith.constant 0 : index
      %248 = vector.load %arg8[%247, %c1_99, %c0_100] : memref<12x10x128xf32, #tpu.memory_space<vmem>>, vector<1x4x128xf32>
      %249 = vector.shape_cast %248 : vector<1x4x128xf32> to vector<4x128xf32>
      %250 = vector.extract_strided_slice %6 {offsets = [29, 0], sizes = [1, 128], strides = [1, 1]} : vector<49x128xf32> to vector<1x128xf32>
      %251 = vector.broadcast %250 : vector<1x128xf32> to vector<4x128xf32>
      %252 = arith.mulf %249, %251 : vector<4x128xf32>
      %253 = arith.addf %245, %252 : vector<4x128xf32>
      %c4_i32_101 = arith.constant 4 : i32
      %254 = arith.addi %12, %c4_i32_101 : i32
      %255 = arith.index_cast %254 : i32 to index
      %c2_102 = arith.constant 2 : index
      %c0_103 = arith.constant 0 : index
      %256 = vector.load %arg8[%255, %c2_102, %c0_103] : memref<12x10x128xf32, #tpu.memory_space<vmem>>, vector<1x4x128xf32>
      %257 = vector.shape_cast %256 : vector<1x4x128xf32> to vector<4x128xf32>
      %258 = vector.extract_strided_slice %6 {offsets = [30, 0], sizes = [1, 128], strides = [1, 1]} : vector<49x128xf32> to vector<1x128xf32>
      %259 = vector.broadcast %258 : vector<1x128xf32> to vector<4x128xf32>
      %260 = arith.mulf %257, %259 : vector<4x128xf32>
      %261 = arith.addf %253, %260 : vector<4x128xf32>
      %c4_i32_104 = arith.constant 4 : i32
      %262 = arith.addi %12, %c4_i32_104 : i32
      %263 = arith.index_cast %262 : i32 to index
      %c3_105 = arith.constant 3 : index
      %c0_106 = arith.constant 0 : index
      %264 = vector.load %arg8[%263, %c3_105, %c0_106] : memref<12x10x128xf32, #tpu.memory_space<vmem>>, vector<1x4x128xf32>
      %265 = vector.shape_cast %264 : vector<1x4x128xf32> to vector<4x128xf32>
      %266 = vector.extract_strided_slice %6 {offsets = [31, 0], sizes = [1, 128], strides = [1, 1]} : vector<49x128xf32> to vector<1x128xf32>
      %267 = vector.broadcast %266 : vector<1x128xf32> to vector<4x128xf32>
      %268 = arith.mulf %265, %267 : vector<4x128xf32>
      %269 = arith.addf %261, %268 : vector<4x128xf32>
      %c4_i32_107 = arith.constant 4 : i32
      %270 = arith.addi %12, %c4_i32_107 : i32
      %271 = arith.index_cast %270 : i32 to index
      %c4_108 = arith.constant 4 : index
      %c0_109 = arith.constant 0 : index
      %272 = vector.load %arg8[%271, %c4_108, %c0_109] : memref<12x10x128xf32, #tpu.memory_space<vmem>>, vector<1x4x128xf32>
      %273 = vector.shape_cast %272 : vector<1x4x128xf32> to vector<4x128xf32>
      %274 = vector.extract_strided_slice %6 {offsets = [32, 0], sizes = [1, 128], strides = [1, 1]} : vector<49x128xf32> to vector<1x128xf32>
      %275 = vector.broadcast %274 : vector<1x128xf32> to vector<4x128xf32>
      %276 = arith.mulf %273, %275 : vector<4x128xf32>
      %277 = arith.addf %269, %276 : vector<4x128xf32>
      %c4_i32_110 = arith.constant 4 : i32
      %278 = arith.addi %12, %c4_i32_110 : i32
      %279 = arith.index_cast %278 : i32 to index
      %c5_111 = arith.constant 5 : index
      %c0_112 = arith.constant 0 : index
      %280 = vector.load %arg8[%279, %c5_111, %c0_112] : memref<12x10x128xf32, #tpu.memory_space<vmem>>, vector<1x4x128xf32>
      %281 = vector.shape_cast %280 : vector<1x4x128xf32> to vector<4x128xf32>
      %282 = vector.extract_strided_slice %6 {offsets = [33, 0], sizes = [1, 128], strides = [1, 1]} : vector<49x128xf32> to vector<1x128xf32>
      %283 = vector.broadcast %282 : vector<1x128xf32> to vector<4x128xf32>
      %284 = arith.mulf %281, %283 : vector<4x128xf32>
      %285 = arith.addf %277, %284 : vector<4x128xf32>
      %c4_i32_113 = arith.constant 4 : i32
      %286 = arith.addi %12, %c4_i32_113 : i32
      %287 = arith.index_cast %286 : i32 to index
      %c6_114 = arith.constant 6 : index
      %c0_115 = arith.constant 0 : index
      %288 = vector.load %arg8[%287, %c6_114, %c0_115] : memref<12x10x128xf32, #tpu.memory_space<vmem>>, vector<1x4x128xf32>
      %289 = vector.shape_cast %288 : vector<1x4x128xf32> to vector<4x128xf32>
      %290 = vector.extract_strided_slice %6 {offsets = [34, 0], sizes = [1, 128], strides = [1, 1]} : vector<49x128xf32> to vector<1x128xf32>
      %291 = vector.broadcast %290 : vector<1x128xf32> to vector<4x128xf32>
      %292 = arith.mulf %289, %291 : vector<4x128xf32>
      %293 = arith.addf %285, %292 : vector<4x128xf32>
      %c5_i32 = arith.constant 5 : i32
      %294 = arith.addi %12, %c5_i32 : i32
      %295 = arith.index_cast %294 : i32 to index
      %c0_116 = arith.constant 0 : index
      %c0_117 = arith.constant 0 : index
      %296 = vector.load %arg8[%295, %c0_116, %c0_117] : memref<12x10x128xf32, #tpu.memory_space<vmem>>, vector<1x4x128xf32>
      %297 = vector.shape_cast %296 : vector<1x4x128xf32> to vector<4x128xf32>
      %298 = vector.extract_strided_slice %6 {offsets = [35, 0], sizes = [1, 128], strides = [1, 1]} : vector<49x128xf32> to vector<1x128xf32>
      %299 = vector.broadcast %298 : vector<1x128xf32> to vector<4x128xf32>
      %300 = arith.mulf %297, %299 : vector<4x128xf32>
      %301 = arith.addf %237, %300 : vector<4x128xf32>
      %c5_i32_118 = arith.constant 5 : i32
      %302 = arith.addi %12, %c5_i32_118 : i32
      %303 = arith.index_cast %302 : i32 to index
      %c1_119 = arith.constant 1 : index
      %c0_120 = arith.constant 0 : index
      %304 = vector.load %arg8[%303, %c1_119, %c0_120] : memref<12x10x128xf32, #tpu.memory_space<vmem>>, vector<1x4x128xf32>
      %305 = vector.shape_cast %304 : vector<1x4x128xf32> to vector<4x128xf32>
      %306 = vector.extract_strided_slice %6 {offsets = [36, 0], sizes = [1, 128], strides = [1, 1]} : vector<49x128xf32> to vector<1x128xf32>
      %307 = vector.broadcast %306 : vector<1x128xf32> to vector<4x128xf32>
      %308 = arith.mulf %305, %307 : vector<4x128xf32>
      %309 = arith.addf %301, %308 : vector<4x128xf32>
      %c5_i32_121 = arith.constant 5 : i32
      %310 = arith.addi %12, %c5_i32_121 : i32
      %311 = arith.index_cast %310 : i32 to index
      %c2_122 = arith.constant 2 : index
      %c0_123 = arith.constant 0 : index
      %312 = vector.load %arg8[%311, %c2_122, %c0_123] : memref<12x10x128xf32, #tpu.memory_space<vmem>>, vector<1x4x128xf32>
      %313 = vector.shape_cast %312 : vector<1x4x128xf32> to vector<4x128xf32>
      %314 = vector.extract_strided_slice %6 {offsets = [37, 0], sizes = [1, 128], strides = [1, 1]} : vector<49x128xf32> to vector<1x128xf32>
      %315 = vector.broadcast %314 : vector<1x128xf32> to vector<4x128xf32>
      %316 = arith.mulf %313, %315 : vector<4x128xf32>
      %317 = arith.addf %309, %316 : vector<4x128xf32>
      %c5_i32_124 = arith.constant 5 : i32
      %318 = arith.addi %12, %c5_i32_124 : i32
      %319 = arith.index_cast %318 : i32 to index
      %c3_125 = arith.constant 3 : index
      %c0_126 = arith.constant 0 : index
      %320 = vector.load %arg8[%319, %c3_125, %c0_126] : memref<12x10x128xf32, #tpu.memory_space<vmem>>, vector<1x4x128xf32>
      %321 = vector.shape_cast %320 : vector<1x4x128xf32> to vector<4x128xf32>
      %322 = vector.extract_strided_slice %6 {offsets = [38, 0], sizes = [1, 128], strides = [1, 1]} : vector<49x128xf32> to vector<1x128xf32>
      %323 = vector.broadcast %322 : vector<1x128xf32> to vector<4x128xf32>
      %324 = arith.mulf %321, %323 : vector<4x128xf32>
      %325 = arith.addf %317, %324 : vector<4x128xf32>
      %c5_i32_127 = arith.constant 5 : i32
      %326 = arith.addi %12, %c5_i32_127 : i32
      %327 = arith.index_cast %326 : i32 to index
      %c4_128 = arith.constant 4 : index
      %c0_129 = arith.constant 0 : index
      %328 = vector.load %arg8[%327, %c4_128, %c0_129] : memref<12x10x128xf32, #tpu.memory_space<vmem>>, vector<1x4x128xf32>
      %329 = vector.shape_cast %328 : vector<1x4x128xf32> to vector<4x128xf32>
      %330 = vector.extract_strided_slice %6 {offsets = [39, 0], sizes = [1, 128], strides = [1, 1]} : vector<49x128xf32> to vector<1x128xf32>
      %331 = vector.broadcast %330 : vector<1x128xf32> to vector<4x128xf32>
      %332 = arith.mulf %329, %331 : vector<4x128xf32>
      %333 = arith.addf %325, %332 : vector<4x128xf32>
      %c5_i32_130 = arith.constant 5 : i32
      %334 = arith.addi %12, %c5_i32_130 : i32
      %335 = arith.index_cast %334 : i32 to index
      %c5_131 = arith.constant 5 : index
      %c0_132 = arith.constant 0 : index
      %336 = vector.load %arg8[%335, %c5_131, %c0_132] : memref<12x10x128xf32, #tpu.memory_space<vmem>>, vector<1x4x128xf32>
      %337 = vector.shape_cast %336 : vector<1x4x128xf32> to vector<4x128xf32>
      %338 = vector.extract_strided_slice %6 {offsets = [40, 0], sizes = [1, 128], strides = [1, 1]} : vector<49x128xf32> to vector<1x128xf32>
      %339 = vector.broadcast %338 : vector<1x128xf32> to vector<4x128xf32>
      %340 = arith.mulf %337, %339 : vector<4x128xf32>
      %341 = arith.addf %333, %340 : vector<4x128xf32>
      %c5_i32_133 = arith.constant 5 : i32
      %342 = arith.addi %12, %c5_i32_133 : i32
      %343 = arith.index_cast %342 : i32 to index
      %c6_134 = arith.constant 6 : index
      %c0_135 = arith.constant 0 : index
      %344 = vector.load %arg8[%343, %c6_134, %c0_135] : memref<12x10x128xf32, #tpu.memory_space<vmem>>, vector<1x4x128xf32>
      %345 = vector.shape_cast %344 : vector<1x4x128xf32> to vector<4x128xf32>
      %346 = vector.extract_strided_slice %6 {offsets = [41, 0], sizes = [1, 128], strides = [1, 1]} : vector<49x128xf32> to vector<1x128xf32>
      %347 = vector.broadcast %346 : vector<1x128xf32> to vector<4x128xf32>
      %348 = arith.mulf %345, %347 : vector<4x128xf32>
      %349 = arith.addf %341, %348 : vector<4x128xf32>
      %c6_i32_136 = arith.constant 6 : i32
      %350 = arith.addi %12, %c6_i32_136 : i32
      %351 = arith.index_cast %350 : i32 to index
      %c0_137 = arith.constant 0 : index
      %c0_138 = arith.constant 0 : index
      %352 = vector.load %arg8[%351, %c0_137, %c0_138] : memref<12x10x128xf32, #tpu.memory_space<vmem>>, vector<1x4x128xf32>
      %353 = vector.shape_cast %352 : vector<1x4x128xf32> to vector<4x128xf32>
      %354 = vector.extract_strided_slice %6 {offsets = [42, 0], sizes = [1, 128], strides = [1, 1]} : vector<49x128xf32> to vector<1x128xf32>
      %355 = vector.broadcast %354 : vector<1x128xf32> to vector<4x128xf32>
      %356 = arith.mulf %353, %355 : vector<4x128xf32>
      %357 = arith.addf %293, %356 : vector<4x128xf32>
      %c6_i32_139 = arith.constant 6 : i32
      %358 = arith.addi %12, %c6_i32_139 : i32
      %359 = arith.index_cast %358 : i32 to index
      %c1_140 = arith.constant 1 : index
      %c0_141 = arith.constant 0 : index
      %360 = vector.load %arg8[%359, %c1_140, %c0_141] : memref<12x10x128xf32, #tpu.memory_space<vmem>>, vector<1x4x128xf32>
      %361 = vector.shape_cast %360 : vector<1x4x128xf32> to vector<4x128xf32>
      %362 = vector.extract_strided_slice %6 {offsets = [43, 0], sizes = [1, 128], strides = [1, 1]} : vector<49x128xf32> to vector<1x128xf32>
      %363 = vector.broadcast %362 : vector<1x128xf32> to vector<4x128xf32>
      %364 = arith.mulf %361, %363 : vector<4x128xf32>
      %365 = arith.addf %357, %364 : vector<4x128xf32>
      %c6_i32_142 = arith.constant 6 : i32
      %366 = arith.addi %12, %c6_i32_142 : i32
      %367 = arith.index_cast %366 : i32 to index
      %c2_143 = arith.constant 2 : index
      %c0_144 = arith.constant 0 : index
      %368 = vector.load %arg8[%367, %c2_143, %c0_144] : memref<12x10x128xf32, #tpu.memory_space<vmem>>, vector<1x4x128xf32>
      %369 = vector.shape_cast %368 : vector<1x4x128xf32> to vector<4x128xf32>
      %370 = vector.extract_strided_slice %6 {offsets = [44, 0], sizes = [1, 128], strides = [1, 1]} : vector<49x128xf32> to vector<1x128xf32>
      %371 = vector.broadcast %370 : vector<1x128xf32> to vector<4x128xf32>
      %372 = arith.mulf %369, %371 : vector<4x128xf32>
      %373 = arith.addf %365, %372 : vector<4x128xf32>
      %c6_i32_145 = arith.constant 6 : i32
      %374 = arith.addi %12, %c6_i32_145 : i32
      %375 = arith.index_cast %374 : i32 to index
      %c3_146 = arith.constant 3 : index
      %c0_147 = arith.constant 0 : index
      %376 = vector.load %arg8[%375, %c3_146, %c0_147] : memref<12x10x128xf32, #tpu.memory_space<vmem>>, vector<1x4x128xf32>
      %377 = vector.shape_cast %376 : vector<1x4x128xf32> to vector<4x128xf32>
      %378 = vector.extract_strided_slice %6 {offsets = [45, 0], sizes = [1, 128], strides = [1, 1]} : vector<49x128xf32> to vector<1x128xf32>
      %379 = vector.broadcast %378 : vector<1x128xf32> to vector<4x128xf32>
      %380 = arith.mulf %377, %379 : vector<4x128xf32>
      %381 = arith.addf %373, %380 : vector<4x128xf32>
      %c6_i32_148 = arith.constant 6 : i32
      %382 = arith.addi %12, %c6_i32_148 : i32
      %383 = arith.index_cast %382 : i32 to index
      %c4_149 = arith.constant 4 : index
      %c0_150 = arith.constant 0 : index
      %384 = vector.load %arg8[%383, %c4_149, %c0_150] : memref<12x10x128xf32, #tpu.memory_space<vmem>>, vector<1x4x128xf32>
      %385 = vector.shape_cast %384 : vector<1x4x128xf32> to vector<4x128xf32>
      %386 = vector.extract_strided_slice %6 {offsets = [46, 0], sizes = [1, 128], strides = [1, 1]} : vector<49x128xf32> to vector<1x128xf32>
      %387 = vector.broadcast %386 : vector<1x128xf32> to vector<4x128xf32>
      %388 = arith.mulf %385, %387 : vector<4x128xf32>
      %389 = arith.addf %381, %388 : vector<4x128xf32>
      %c6_i32_151 = arith.constant 6 : i32
      %390 = arith.addi %12, %c6_i32_151 : i32
      %391 = arith.index_cast %390 : i32 to index
      %c5_152 = arith.constant 5 : index
      %c0_153 = arith.constant 0 : index
      %392 = vector.load %arg8[%391, %c5_152, %c0_153] : memref<12x10x128xf32, #tpu.memory_space<vmem>>, vector<1x4x128xf32>
      %393 = vector.shape_cast %392 : vector<1x4x128xf32> to vector<4x128xf32>
      %394 = vector.extract_strided_slice %6 {offsets = [47, 0], sizes = [1, 128], strides = [1, 1]} : vector<49x128xf32> to vector<1x128xf32>
      %395 = vector.broadcast %394 : vector<1x128xf32> to vector<4x128xf32>
      %396 = arith.mulf %393, %395 : vector<4x128xf32>
      %397 = arith.addf %389, %396 : vector<4x128xf32>
      %c6_i32_154 = arith.constant 6 : i32
      %398 = arith.addi %12, %c6_i32_154 : i32
      %399 = arith.index_cast %398 : i32 to index
      %c6_155 = arith.constant 6 : index
      %c0_156 = arith.constant 0 : index
      %400 = vector.load %arg8[%399, %c6_155, %c0_156] : memref<12x10x128xf32, #tpu.memory_space<vmem>>, vector<1x4x128xf32>
      %401 = vector.shape_cast %400 : vector<1x4x128xf32> to vector<4x128xf32>
      %402 = vector.extract_strided_slice %6 {offsets = [48, 0], sizes = [1, 128], strides = [1, 1]} : vector<49x128xf32> to vector<1x128xf32>
      %403 = vector.broadcast %402 : vector<1x128xf32> to vector<4x128xf32>
      %404 = arith.mulf %401, %403 : vector<4x128xf32>
      %405 = arith.addf %397, %404 : vector<4x128xf32>
      %406 = arith.addf %405, %349 : vector<4x128xf32>
      %c0_157 = arith.constant 0 : index
      %407 = arith.index_cast %12 : i32 to index
      %c0_158 = arith.constant 0 : index
      %c0_159 = arith.constant 0 : index
      %408 = vector.load %arg7[%c0_157, %407, %c0_158, %c0_159] : memref<1x6x4x128xf32, #tpu.memory_space<vmem>>, vector<1x1x4x128xf32>
      %409 = vector.shape_cast %408 : vector<1x1x4x128xf32> to vector<4x128xf32>
      %410 = vector.shape_cast %406 : vector<4x128xf32> to vector<1x1x4x128xf32>
      tpu.vector_store %arg7[%c0_157, %407, %c0_158, %c0_159], %410 {strides = array<i32>} : memref<1x6x4x128xf32, #tpu.memory_space<vmem>>, vector<1x1x4x128xf32>,
    }
    %c6_i32_16 = arith.constant 6 : i32
    return
  }
  func.func @transform_0(%arg0: i32, %arg1: i32, %arg2: i32) -> (i32, i32, i32, i32) {
    %c0_i32 = arith.constant 0 : i32
    %c0_i32_0 = arith.constant 0 : i32
    return %arg0, %arg2, %c0_i32, %arg1 : i32, i32, i32, i32
  }
  func.func @transform_1(%arg0: i32, %arg1: i32, %arg2: i32) -> (i32, i32, i32, i32) {
    %c1_i32 = arith.constant 1 : i32
    %0 = arith.addi %arg2, %c1_i32 : i32
    %c1_i32_0 = arith.constant 1 : i32
    %1 = arith.muli %0, %c1_i32_0 : i32
    %c0_i32 = arith.constant 0 : i32
    %c0_i32_1 = arith.constant 0 : i32
    return %arg0, %1, %c0_i32, %arg1 : i32, i32, i32, i32
  }
  func.func @transform_2(%arg0: i32, %arg1: i32, %arg2: i32) -> (i32, i32) {
    %c0_i32 = arith.constant 0 : i32
    %c0_i32_0 = arith.constant 0 : i32
    return %c0_i32, %arg1 : i32, i32
  }
  func.func @transform_3(%arg0: i32, %arg1: i32, %arg2: i32) -> (i32, i32) {
    %c0_i32 = arith.constant 0 : i32
    %c0_i32_0 = arith.constant 0 : i32
    return %c0_i32, %arg1 : i32, i32
  }
  func.func @transform_4(%arg0: i32, %arg1: i32, %arg2: i32) -> (i32, i32, i32, i32) {
    %c0_i32 = arith.constant 0 : i32
    %c0_i32_0 = arith.constant 0 : i32
    return %arg0, %arg2, %c0_i32, %arg1 : i32, i32, i32, i32
  }
}

</mosaic_0001>

<bundles_post_ra>
// kernel: tpu_custom_call.1
= control target key start
LH: loop header
LB: loop body
LE: loop exit
PB: predicated region body
PF: predicated region fallthrough
CT: control target
= control target key end

     0   :  { %9 = vsyncpa [#allocation4], 0  ;;  %s1565_s0 = inlined_call_operand.vmem [shape: f32[2,12,10,128], index: 0, kind: input, shape index: {}]   ;;  %s1566_s1 = inlined_call_operand.vmem [shape: f32[2,12,10,128], index: 1, kind: input, shape index: {}]   ;;  %s1567_s2 = inlined_call_operand.vmem [shape: f32[49,128], index: 2, kind: input, shape index: {}]   ;;  %s1568_s3 = inlined_call_operand.vmem [shape: f32[1,128], index: 3, kind: input, shape index: {}]   ;;  %s1569_s4 = inlined_call_operand.hbm [shape: f32[2,6,4,128], index: 4, kind: output, shape index: {}]  }
   0x1   :  { %11 = vsyncpa [#allocation4 + $0x1], 0  ;;  %s1208_s15 = smov 0   ;;  %s1210_s16 = smov 0  }
   0x2   :  { %s1212_s17 = smov 0   ;;  %s1214_s18 = smov 0  }
   0x3   :  { %s1216_s19 = smov 0   ;;  %s1218_s20 = smov 0  }
   0x4 LB: > { %s958_s21 = sadd.s32 4294967295, %s1174_s20   ;;  %s959_s22 = sadd.s32 4294967294, %s1174_s20   ;;  %s1174_s20 = sphi %s1218_s20, %s17_s20   ;;  %s1170_s19 = sphi %s1216_s19, %s1576_s19   ;;  %s1166_s18 = sphi %s1214_s18, %s1575_s18   ;;  %s1162_s17 = sphi %s1212_s17, %s1574_s17   ;;  %s1158_s16 = sphi %s1210_s16, %s1573_s16   ;;  %s1154_s15 = sphi %s1208_s15, %s1572_s15  }
   0x5   : > { %s36_s23 = sadd.s32 1, %s1170_s19  ;;  %s161_s24 = sadd.s32 1, %s1162_s17 }
   0x6   : > { %p38_p0 = scmp.ge.s32.totalorder %s36_s23, 2  ;;  %p171_p1 = scmp.ne.s32.totalorder %s1162_s17, %s1158_s16 }
   0x7   : > { %p172_p2 = scmp.eq.s32.totalorder %s958_s21, 1  ;;  %p177_p3 = scmp.ne.s32.totalorder %s1158_s16, %s1154_s15 }
   0x8   : > { %s1578_s23 = smov (%p38_p0, %s36_s23), 0  ;;  %p178_p5 = scmp.eq.s32.totalorder %s959_s22, 1 }
   0x9   : > { %p1248_p4 = por %p172_p2, %p171_p1  ;;  %s154_s26 = ssub.s32 %s1170_s19, %s1578_s23 }
   0xa   : > { %p964_p6 = scmp.ge.s32.totalorder %s1174_s20, 1  ;;  %p159_p7 = scmp.eq.s32.totalorder %s154_s26, 0 }
   0xb   : > { %p1255_p8 = por %p178_p5, %p177_p3  ;;  %p245_p9 = scmp.lt.s32.totalorder %s1174_s20, 3 }
   0xc   : > { %s1261_s28 = scalar_select %p159_p7, %s1162_s17, %s161_s24  }
   0xd   : > { %p246_p10 = pnand %p964_p6, %p245_p9 }
   0xe   : > { %s297_s29 = sand.u32 (!%p246_p10), 1, %s1158_s16   ;;  %p301_p11 = scmp.lt.s32.totalorder (!%p246_p10), %s1166_s18, 1 }
   0xf   : > { %249 = sbr.rel (%p246_p10) target bundleno = 120 (0x78), region = 36 }
  0x10   : > { %s1282_s10 = smul.u32 (!%p246_p10), 24, %s297_s29 }
  0x12   : > { %s299_s22 = scalar_lea.vmem (!%p246_p10), [#allocation3], %s1282_s10 }
  0x14   : > { %v1268_v0 = vld [vmem:[%s1567_s2] sm:$0xff]  ;;  %v1273_v1 = vld [vmem:[%s1567_s2 + $0x8] sm:$0xff]  ;;  %v1278_v2 = vld [vmem:[%s1567_s2 + $0x10] sm:$0xff]  ;;  %s302_s24 = scalar_select %p301_p11, %s1166_s18, 1 }
  0x15   : > { %v1287_v3 = vld [vmem:[%s1567_s2 + $0x18] sm:$0xff]  ;;  %v1292_v4 = vld [vmem:[%s1567_s2 + $0x20] sm:$0xff]  ;;  %v1297_v5 = vld [vmem:[%s1567_s2 + $0x28] sm:$0xff] }
  0x16   : > { %v1303_v6 = vld [vmem:[%s1567_s2 + $0x30] ss:$0 sm:$0xff]  ;;  %v1308_v7 = vld [vmem:[%s1568_s3] ss:$0 sm:$0xff]  ;;  %s1025_s7 = smul.u32 192, %s302_s24  ;;  %s1331_s24 = smov 0  }
  0x18   : > { %s312_s11 = scalar_lea.vmem %s1565_s0, %s1025_s7  ;;  %s1023_s12 = sadd.s32 96, %s1025_s7 }
  0x19   : > { %v338_v8 = vld [vmem:[%s312_s11] sm:$0xff]  ;;  %v339_v9 = vld [vmem:[%s312_s11 + $0x8] sm:$0x3]  ;;  %v340_v10 = vld [vmem:[%s312_s11 + $0x10] sm:$0xff]  ;;  %s1316_s21 = scalar_lea.vmem %s1566_s1, %s1023_s12 }
  0x1a   : > { %350 = vst [vmem:[#allocation2] sm:$0xff] %v338_v8  ;;  %351 = vst [vmem:[#allocation2 + $0x8] sm:$0x3] %v339_v9  ;;  %v341_v11 = vld [vmem:[%s312_s11 + $0x18] sm:$0x3]  ;;  %v342_v12 = vld [vmem:[%s312_s11 + $0x20] sm:$0xff] }
  0x1b   : > { %352 = vst [vmem:[#allocation2 + $0x10] sm:$0xff] %v340_v10  ;;  %v343_v13 = vld [vmem:[%s312_s11 + $0x28] sm:$0x3]  ;;  %353 = vst [vmem:[#allocation2 + $0x18] sm:$0x3] %v341_v11  ;;  %v344_v14 = vld [vmem:[%s312_s11 + $0x30] sm:$0xff] }
  0x1c   : > { %354 = vst [vmem:[#allocation2 + $0x20] sm:$0xff] %v342_v12  ;;  %355 = vst [vmem:[#allocation2 + $0x28] sm:$0x3] %v343_v13  ;;  %v345_v15 = vld [vmem:[%s312_s11 + $0x38] sm:$0x3]  ;;  %v346_v16 = vld [vmem:[%s312_s11 + $0x40] sm:$0xff] }
  0x1d   : > { %356 = vst [vmem:[#allocation2 + $0x30] sm:$0xff] %v344_v14  ;;  %357 = vst [vmem:[#allocation2 + $0x38] sm:$0x3] %v345_v15  ;;  %v347_v17 = vld [vmem:[%s312_s11 + $0x48] sm:$0x3]  ;;  %v348_v18 = vld [vmem:[%s312_s11 + $0x50] sm:$0xff] }
  0x1e   : > { %358 = vst [vmem:[#allocation2 + $0x40] sm:$0xff] %v346_v16  ;;  %v349_v19 = vld [vmem:[%s312_s11 + $0x58] sm:$0x3]  ;;  %359 = vst [vmem:[#allocation2 + $0x48] sm:$0x3] %v347_v17  ;;  %v362_v20 = vld [vmem:[%s1316_s21] sm:$0xff] }
  0x1f   : > { %360 = vst [vmem:[#allocation2 + $0x50] sm:$0xff] %v348_v18  ;;  %361 = vst [vmem:[#allocation2 + $0x58] sm:$0x3] %v349_v19  ;;  %v363_v21 = vld [vmem:[%s1316_s21 + $0x8] sm:$0x3]  ;;  %v364_v22 = vld [vmem:[%s1316_s21 + $0x10] sm:$0xff] }
  0x20   : > { %375 = vst [vmem:[#allocation2 + $0x60] sm:$0xff] %v362_v20  ;;  %376 = vst [vmem:[#allocation2 + $0x68] sm:$0x3] %v363_v21  ;;  %v365_v23 = vld [vmem:[%s1316_s21 + $0x18] sm:$0x3]  ;;  %v366_v24 = vld [vmem:[%s1316_s21 + $0x20] sm:$0xff] }
  0x21   : > { %377 = vst [vmem:[#allocation2 + $0x70] sm:$0xff] %v364_v22  ;;  %v367_v25 = vld [vmem:[%s1316_s21 + $0x28] sm:$0x3]  ;;  %378 = vst [vmem:[#allocation2 + $0x78] sm:$0x3] %v365_v23  ;;  %v368_v26 = vld [vmem:[%s1316_s21 + $0x30] sm:$0xff] }
  0x22   : > { %379 = vst [vmem:[#allocation2 + $0x80] sm:$0xff] %v366_v24  ;;  %380 = vst [vmem:[#allocation2 + $0x88] sm:$0x3] %v367_v25  ;;  %v369_v27 = vld [vmem:[%s1316_s21 + $0x38] sm:$0x3]  ;;  %v370_v28 = vld [vmem:[%s1316_s21 + $0x40] sm:$0xff] }
  0x23   : > { %381 = vst [vmem:[#allocation2 + $0x90] sm:$0xff] %v368_v26  ;;  %382 = vst [vmem:[#allocation2 + $0x98] sm:$0x3] %v369_v27  ;;  %v371_v29 = vld [vmem:[%s1316_s21 + $0x48] sm:$0x3]  ;;  %v372_v30 = vld [vmem:[%s1316_s21 + $0x50] sm:$0xff] }
  0x24   : > { %383 = vst [vmem:[#allocation2 + $0xa0] sm:$0xff] %v370_v28  ;;  %v373_v31 = vld [vmem:[%s1316_s21 + $0x58] sm:$0x3]  ;;  %384 = vst [vmem:[#allocation2 + $0xa8] sm:$0x3] %v371_v29 }
  0x25   : > { %385 = vst [vmem:[#allocation2 + $0xb0] sm:$0xff] %v372_v30  ;;  %386 = vst [vmem:[#allocation2 + $0xb8] sm:$0x3] %v373_v31 }
  0x26 LB: >> { %v410_v32 = vlaneseq  ;;  %s968_s26 = sshll.u32 %s1178_s24, 4  ;;  %s1018_s5 = sshll.u32 %s1178_s24, 2  ;;  %s1178_s24 = sphi %s1331_s24, %s406_s24  }
  0x27   : >> { %s1341_s30 = scalar_lea.vmem [#allocation2], %s968_s26  ;;  %s772_s6 = scalar_lea.vmem %s299_s22, %s1018_s5 [#allocation3] }
  0x28   : >> { %v411_v33 = vshrl.u32 %v410_v32, 7  ;;  %s406_s24 = sadd.s32 1, %s1178_s24  }
  0x29   : >> { %p403_p12 = scmp.ge.s32.totalorder %s406_s24, 6  }
  0x2a   : >> { %v1337_v34 = vsub.s32 0, %v411_v33  ;;  %v1339_v35 = vsub.s32 1, %v411_v33  ;;  %v1345_v38 = vsub.s32 2, %v411_v33  ;;  %v1347_v39 = vsub.s32 3, %v411_v33  ;;  %s1027_s7 = smul.u32 (%p403_p12), 384, %s1166_s18  ;;  %s791_s8 = sshll.u32 (%p403_p12), %s299_s22, 4  ;;  %s1516_s8 = int_to_ptr.vmem [resolvable:$true] %s791_s8 }
  0x2b   : >> { %v1353_v42 = vsub.s32 4, %v411_v33  ;;  %v1358_v45 = vsub.s32 5, %v411_v33  ;;  %v1360_v46 = vsub.s32 7, %v411_v33  ;;  %v1368_v53 = vsub.s32 6, %v411_v33  ;;  %s1520_s13 = scalar_lea.sflag (%p403_p12), [#allocation4], %s297_s29  ;;  %s1094_s14 = scalar_lea.vmem (%p403_p12), %s1516_s8, 384 }
  0x2c   : >> { %v409_v36 = vld [vmem:[%s1341_s30] sm:$0xf]  ;;  %v413_v40 = vrot.slane %v1268_v0, %v1337_v34  ;;  %v420_v41 = vrot.slane %v1268_v0, %v1339_v35  ;;  %v427_v44 = vrot.slane %v1268_v0, %v1345_v38  ;;  %v434_v49 = vrot.slane %v1268_v0, %v1347_v39  ;;  %v970_v50 = vld [vmem:[%s1341_s30 + $0x10] sm:$0xf]  ;;  %v437_v58 = vld [vmem:[%s1341_s30 + $0x4] sm:$0xf]  ;;  %s1514_s12 = scalar_lea.hbm (%p403_p12), %s1569_s4, %s1027_s7  ;;  %p1095_p13 = scmp.ne.s32.totalorder (%p403_p12), %s1516_s8, %s1094_s14 }
  0x2d   : >> { %v416_v37 = vld [vmem:[%s1341_s30 + $0x1] sm:$0xf]  ;;  %v441_v52 = vrot.slane %v1268_v0, %v1353_v42  ;;  %v465_v54 = vrot.slane %v1268_v0, %v1360_v46  ;;  %v971_v55 = vld [vmem:[%s1341_s30 + $0x11] sm:$0xf]  ;;  %v472_v59 = vrot.slane %v1273_v1, %v1337_v34  ;;  %v448_v61 = vrot.slane %v1268_v0, %v1358_v45  ;;  %v444_v12 = vld [vmem:[%s1341_s30 + $0x5] sm:$0xf] }
  0x2e   : >> { %v423_v43 = vld [vmem:[%s1341_s30 + $0x2] sm:$0xf]  ;;  %v414_v47 = vmul.f32 %v413_v40, %v409_v36  ;;  %v421_v48 = vmul.f32 %v420_v41, %v416_v37  ;;  %v972_v60 = vld [vmem:[%s1341_s30 + $0x12] sm:$0xf]  ;;  %v479_v63 = vrot.slane %v1273_v1, %v1339_v35  ;;  %v486_v9 = vrot.slane %v1273_v1, %v1345_v38  ;;  %v451_v24 = vld [vmem:[%s1341_s30 + $0x6] sm:$0xf]  ;;  %p1096_p0 = pnand (%p403_p12), %p1095_p13, %p1248_p4 }
  0x2f   : >> { %v430_v51 = vld [vmem:[%s1341_s30 + $0x3] sm:$0xf]  ;;  %v428_v57 = vmul.f32 %v427_v44, %v423_v43  ;;  %v466_v62 = vmul.f32 %v970_v50, %v465_v54  ;;  %v973_v8 = vld [vmem:[%s1341_s30 + $0x13] sm:$0xf]  ;;  %v473_v13 = vmul.f32 %v971_v55, %v472_v59  ;;  %v493_v14 = vrot.slane %v1273_v1, %v1347_v39  ;;  %s1180_s18 = smov (%p403_p12), [#allocation3]  }
  0x30   : >> { %v415_v56 = vadd.f32 %v1308_v7, %v414_v47  ;;  %v435_v11 = vmul.f32 %v434_v49, %v430_v51  ;;  %v442_v15 = vmul.f32 %v441_v52, %v437_v58  ;;  %v455_v16 = vrot.slane %v1268_v0, %v1368_v53  ;;  %v974_v18 = vld [vmem:[%s1341_s30 + $0x14] sm:$0xf]  ;;  %v978_v32 = vld [vmem:[%s1341_s30 + $0x20] sm:$0xf]  ;;  %p1097_p1 = pneg (%p403_p12), %p1096_p0  ;;  %s1098_s10 = sshll.u32 (%p403_p12), %s1180_s18, 4  ;;  %s1099_s10 = int_to_ptr.vmem [resolvable:$false] %s1098_s10 }
  0x31   : >> { %v480_v17 = vmul.f32 %v972_v60, %v479_v63  ;;  %v474_v20 = vadd.f32 %v473_v13, %v466_v62  ;;  %v487_v21 = vmul.f32 %v973_v8, %v486_v9  ;;  %v500_v22 = vrot.slane %v1273_v1, %v1353_v42  ;;  %v975_v25 = vld [vmem:[%s1341_s30 + $0x15] sm:$0xf]  ;;  %v979_v43 = vld [vmem:[%s1341_s30 + $0x21] sm:$0xf]  ;;  %v987_v58 = vld [vmem:[%s1341_s30 + $0x31] sm:$0xf]  ;;  %p1101_p2 = scmp.lt.s32.totalorder (%p403_p12), %s1516_s8, %s1099_s10 }
  0x32   : >> { %v422_v10 = vadd.f32 %v421_v48, %v415_v56  ;;  %v449_v23 = vmul.f32 %v448_v61, %v444_v12  ;;  %v507_v26 = vrot.slane %v1273_v1, %v1358_v45  ;;  %v494_v29 = vmul.f32 %v974_v18, %v493_v14  ;;  %v976_v30 = vld [vmem:[%s1341_s30 + $0x16] sm:$0xf]  ;;  %v986_v48 = vld [vmem:[%s1341_s30 + $0x30] sm:$0xf]  ;;  %v980_v54 = vld [vmem:[%s1341_s30 + $0x22] sm:$0xf] }
  0x33   : >> { %v481_v28 = vadd.f32 %v480_v17, %v474_v20  ;;  %v517_v31 = vrot.slane %v1273_v1, %v1368_v53  ;;  %v524_v33 = vrot.slane %v1273_v1, %v1360_v46  ;;  %v456_v37 = vmul.f32 %v455_v16, %v451_v24  ;;  %v981_v61 = vld [vmem:[%s1341_s30 + $0x23] sm:$0xf]  ;;  %v989_v18 = vld [vmem:[%s1341_s30 + $0x33] sm:$0xf]  ;;  %s1100_s21 = scalar_lea.vmem (%p403_p12), %s1099_s10, 768 }
  0x34   : >> { %v429_v19 = vadd.f32 %v428_v57, %v422_v10  ;;  %v501_v41 = vmul.f32 %v975_v25, %v500_v22  ;;  %v508_v44 = vmul.f32 %v976_v30, %v507_v26  ;;  %v531_v47 = vrot.slane %v1278_v2, %v1337_v34  ;;  %v988_v10 = vld [vmem:[%s1341_s30 + $0x32] sm:$0xf]  ;;  %v982_v16 = vld [vmem:[%s1341_s30 + $0x24] sm:$0xf]  ;;  %p1102_p3 = scmp.lt.s32.totalorder (%p403_p12), %s1100_s21, %s1094_s14 }
  0x35   : >> { %v488_v40 = vadd.f32 %v487_v21, %v481_v28  ;;  %v569_v49 = vrot.slane %v1278_v2, %v1358_v45  ;;  %v518_v52 = vmul.f32 %v978_v32, %v517_v31  ;;  %v576_v55 = vrot.slane %v1278_v2, %v1368_v53  ;;  %v983_v20 = vld [vmem:[%s1341_s30 + $0x25] sm:$0xf]  ;;  %v990_v25 = vld [vmem:[%s1341_s30 + $0x34] sm:$0xf] }
  0x36   : >> { %v436_v27 = vadd.f32 %v435_v11, %v429_v19  ;;  %v525_v56 = vmul.f32 %v979_v43, %v524_v33  ;;  %v538_v57 = vrot.slane %v1278_v2, %v1339_v35  ;;  %v583_v63 = vrot.slane %v1278_v2, %v1360_v46  ;;  %v991_v32 = vld [vmem:[%s1341_s30 + $0x35] sm:$0xf]  ;;  %p1103_p5 = por (%p403_p12), %p1102_p3, %p1101_p2 }
  0x37   : >> { %v495_v51 = vadd.f32 %v494_v29, %v488_v40  ;;  %v570_v62 = vmul.f32 %v986_v48, %v569_v49  ;;  %v532_v8 = vmul.f32 %v980_v54, %v531_v47  ;;  %v545_v9 = vrot.slane %v1278_v2, %v1345_v38  ;;  %v984_v29 = vld [vmem:[%s1341_s30 + $0x26] sm:$0xf]  ;;  %v992_v43 = vld [vmem:[%s1341_s30 + $0x36] sm:$0xf]  ;;  %v994_v49 = vld [vmem:[%s1341_s30 + $0x40] sm:$0xf] }
  0x38   : >> { %v443_v36 = vadd.f32 %v442_v15, %v436_v27  ;;  %v577_v13 = vmul.f32 %v987_v58, %v576_v55  ;;  %v590_v14 = vrot.slane %v1287_v3, %v1337_v34  ;;  %v539_v15 = vmul.f32 %v981_v61, %v538_v57  ;;  %v1002_v58 = vld [vmem:[%s1341_s30 + $0x50] sm:$0xf]  ;;  %p1104_p6 = pnand (%p403_p12), %p1103_p5, %p1097_p1 }
  0x39   : >> { %v502_v60 = vadd.f32 %v501_v41, %v495_v51  ;;  %v552_v17 = vrot.slane %v1278_v2, %v1347_v39  ;;  %v584_v22 = vmul.f32 %v988_v10, %v583_v63  ;;  %v559_v24 = vrot.slane %v1278_v2, %v1353_v42 }
  0x3a   : >> { %v450_v50 = vadd.f32 %v449_v23, %v443_v36  ;;  %v597_v23 = vrot.slane %v1287_v3, %v1339_v35  ;;  %v604_v26 = vrot.slane %v1287_v3, %v1345_v38  ;;  %v546_v28 = vmul.f32 %v982_v16, %v545_v9  ;;  %v1003_v9 = vld [vmem:[%s1341_s30 + $0x51] sm:$0xf] }
  0x3b   : >> { %v509_v11 = vadd.f32 %v508_v44, %v502_v60  ;;  %v591_v31 = vmul.f32 %v989_v18, %v590_v14  ;;  %v553_v33 = vmul.f32 %v983_v20, %v552_v17  ;;  %v611_v36 = vrot.slane %v1287_v3, %v1347_v39 }
  0x3c   : >> { %v457_v59 = vadd.f32 %v456_v37, %v450_v50  ;;  %v598_v41 = vmul.f32 %v990_v25, %v597_v23  ;;  %v621_v44 = vrot.slane %v1287_v3, %v1353_v42  ;;  %v560_v47 = vmul.f32 %v984_v29, %v559_v24 }
  0x3d   : >> { %v571_v21 = vadd.f32 %v570_v62, %v509_v11  ;;  %v605_v48 = vmul.f32 %v991_v32, %v604_v26  ;;  %v673_v54 = vrot.slane %v1292_v4, %v1347_v39  ;;  %v612_v55 = vmul.f32 %v992_v43, %v611_v36  ;;  %v996_v62 = vld [vmem:[%s1341_s30 + $0x42] sm:$0xf] }
  0x3e   : >> { %v519_v12 = vadd.f32 %v518_v52, %v457_v59  ;;  %v628_v52 = vrot.slane %v1287_v3, %v1358_v45  ;;  %v635_v57 = vrot.slane %v1287_v3, %v1368_v53  ;;  %v622_v61 = vmul.f32 %v994_v49, %v621_v44 }
  0x3f   : >> { %v578_v30 = vadd.f32 %v577_v13, %v571_v21  ;;  %v680_v63 = vrot.slane %v1292_v4, %v1353_v42  ;;  %v674_v13 = vmul.f32 %v1002_v58, %v673_v54  ;;  %v649_v16 = vrot.slane %v1292_v4, %v1337_v34 }
  0x40   : >> { %v526_v19 = vadd.f32 %v525_v56, %v519_v12  ;;  %v995_v56 = vld [vmem:[%s1341_s30 + $0x41] sm:$0xf]  ;;  %v636_v14 = vmul.f32 %v996_v62, %v635_v57  ;;  %v687_v21 = vrot.slane %v1292_v4, %v1358_v45  ;;  %v656_v25 = vrot.slane %v1292_v4, %v1339_v35 }
  0x41   : >> { %v585_v40 = vadd.f32 %v584_v22, %v578_v30  ;;  %v629_v12 = vmul.f32 %v995_v56, %v628_v52  ;;  %v681_v20 = vmul.f32 %v1003_v9, %v680_v63  ;;  %v1004_v22 = vld [vmem:[%s1341_s30 + $0x52] sm:$0xf]  ;;  %v663_v29 = vrot.slane %v1292_v4, %v1345_v38  ;;  %v1013_v9 = vld [vmem:[%s1341_s30 + $0x63] sm:$0xf] }
  0x42   : >> { %v533_v27 = vadd.f32 %v532_v8, %v526_v19  ;;  %v642_v8 = vrot.slane %v1287_v3, %v1360_v46  ;;  %v998_v19 = vld [vmem:[%s1341_s30 + $0x44] sm:$0xf]  ;;  %v694_v36 = vrot.slane %v1292_v4, %v1368_v53  ;;  %v725_v43 = vrot.slane %v1297_v5, %v1345_v38  ;;  %v1006_v52 = vld [vmem:[%s1341_s30 + $0x54] sm:$0xf] }
  0x43   : >> { %v592_v51 = vadd.f32 %v591_v31, %v585_v40  ;;  %v1000_v31 = vld [vmem:[%s1341_s30 + $0x46] sm:$0xf]  ;;  %v732_v54 = vrot.slane %v1297_v5, %v1347_v39  ;;  %v739_v38 = vrot.slane %v1297_v5, %v1353_v42  ;;  %v1007_v63 = vld [vmem:[%s1341_s30 + $0x55] sm:$0xf]  ;;  %v746_v39 = vrot.slane %v1297_v5, %v1358_v45 }
  0x44   : >> { %v540_v37 = vadd.f32 %v539_v15, %v533_v27  ;;  %v997_v15 = vld [vmem:[%s1341_s30 + $0x43] sm:$0xf]  ;;  %v650_v27 = vmul.f32 %v998_v19, %v649_v16  ;;  %v664_v44 = vmul.f32 %v1000_v31, %v663_v29  ;;  %v753_v42 = vrot.slane %v1297_v5, %v1368_v53  ;;  %v1008_v45 = vld [vmem:[%s1341_s30 + $0x56] sm:$0xf] }
  0x45   : >> { %v599_v60 = vadd.f32 %v598_v41, %v592_v51  ;;  %v643_v24 = vmul.f32 %v997_v15, %v642_v8  ;;  %v747_v16 = vmul.f32 %v1013_v9, %v746_v39 }
  0x46   : >> { %v547_v50 = vadd.f32 %v546_v28, %v540_v37  ;;  %v999_v28 = vld [vmem:[%s1341_s30 + $0x45] sm:$0xf]  ;;  %v1005_v37 = vld [vmem:[%s1341_s30 + $0x53] sm:$0xf] }
  0x47   : >> { %v606_v11 = vadd.f32 %v605_v48, %v599_v60  ;;  %v657_v41 = vmul.f32 %v999_v28, %v656_v25  ;;  %v1010_v48 = vld [vmem:[%s1341_s30 + $0x60] sm:$0xf]  ;;  %v695_v51 = vmul.f32 %v1005_v37, %v694_v36 }
  0x48   : >> { %v554_v59 = vadd.f32 %v553_v33, %v547_v50  ;;  %v688_v33 = vmul.f32 %v1004_v22, %v687_v21  ;;  %v726_v57 = vmul.f32 %v1010_v48, %v725_v43  ;;  %v1012_v60 = vld [vmem:[%s1341_s30 + $0x62] sm:$0xf]  ;;  %v1016_v21 = vld [vmem:[%s1341_s30 + $0x66] sm:$0xf] }
  0x49   : >> { %v613_v17 = vadd.f32 %v612_v55, %v606_v11  ;;  %v1011_v55 = vld [vmem:[%s1341_s30 + $0x61] sm:$0xf]  ;;  %v740_v11 = vmul.f32 %v1012_v60, %v739_v38 }
  0x4a   : >> { %v561_v10 = vadd.f32 %v560_v47, %v554_v59  ;;  %v701_v47 = vrot.slane %v1292_v4, %v1360_v46  ;;  %v708_v59 = vrot.slane %v1297_v5, %v1337_v34  ;;  %v733_v8 = vmul.f32 %v1011_v55, %v732_v54 }
  0x4b   : >> { %v675_v26 = vadd.f32 %v674_v13, %v613_v17  ;;  %v715_v34 = vrot.slane %v1297_v5, %v1339_v35  ;;  %v1014_v13 = vld [vmem:[%s1341_s30 + $0x64] sm:$0xf]  ;;  %v760_v17 = vrot.slane %v1297_v5, %v1360_v46  ;;  %v768_v35 = vmul.f32 %v1303_v6, %v1016_v21 }
  0x4c   : >> { %v623_v18 = vadd.f32 %v622_v61, %v561_v10  ;;  %v702_v58 = vmul.f32 %v1006_v52, %v701_v47 }
  0x4d   : >> { %v682_v32 = vadd.f32 %v681_v20, %v675_v26  ;;  %v754_v20 = vmul.f32 %v1014_v13, %v753_v42  ;;  %v716_v53 = vmul.f32 %v1008_v45, %v715_v34 }
  0x4e   : >> { %v630_v23 = vadd.f32 %v629_v12, %v623_v18  ;;  %v709_v12 = vmul.f32 %v1007_v63, %v708_v59  ;;  %v1015_v18 = vld [vmem:[%s1341_s30 + $0x65] sm:$0xf] }
  0x4f   : >> { %v689_v50 = vadd.f32 %v688_v33, %v682_v32 }
  0x50   : >> { %v637_v30 = vadd.f32 %v636_v14, %v630_v23 }
  0x51   : >> { %v696_v62 = vadd.f32 %v695_v51, %v689_v50 }
  0x52   : >> { %v644_v40 = vadd.f32 %v643_v24, %v637_v30  ;;  %v761_v24 = vmul.f32 %v1015_v18, %v760_v17 }
  0x53   : >> { %v703_v14 = vadd.f32 %v702_v58, %v696_v62 }
  0x54   : >> { %v651_v49 = vadd.f32 %v650_v27, %v644_v40 }
  0x55   : >> { %v710_v22 = vadd.f32 %v709_v12, %v703_v14 }
  0x56   : >> { %v658_v56 = vadd.f32 %v657_v41, %v651_v49 }
  0x57   : >> { %v717_v26 = vadd.f32 %v716_v53, %v710_v22 }
  0x58   : >> { %v665_v61 = vadd.f32 %v664_v44, %v658_v56 }
  0x5a   : >> { %v727_v10 = vadd.f32 %v726_v57, %v665_v61 }
  0x5c   : >> { %v734_v15 = vadd.f32 %v733_v8, %v727_v10 }
  0x5e   : >> { %v741_v19 = vadd.f32 %v740_v11, %v734_v15 }
  0x60   : >> { %v748_v23 = vadd.f32 %v747_v16, %v741_v19 }
  0x62   : >> { %v755_v25 = vadd.f32 %v754_v20, %v748_v23 }
  0x64   : >> { %v762_v27 = vadd.f32 %v761_v24, %v755_v25 }
  0x66   : >> { %v769_v28 = vadd.f32 %v768_v35, %v762_v27  ;;  %405 = sbr.rel (!%p403_p12) target bundleno = 38 (0x26), region = 96 }
  0x68   : >> { %v770_v46 = vadd.f32 %v769_v28, %v717_v26 }
  0x6a   : >> { %773 = vst [vmem:[%s772_s6] sm:$0xf] %v770_v46 }
  0x6b   : > { %1107 = shalt.err (!%p1104_p6)
}
  0x6c   : > { %s1108_s29 = scalar_lea.hbm %s1514_s12, 384  ;;  %s1112_s26 = scalar_lea.hbm %s1569_s4, 768 }
  0x6d   : > { %p1109_p7 = scmp.ne.s32.totalorder %s1514_s12, %s1108_s29  ;;  %p1113_p11 = scmp.lt.s32.totalorder %s1514_s12, %s1569_s4 }
  0x6e   : > { %p1114_p12 = scmp.lt.s32.totalorder %s1112_s26, %s1108_s29 }
  0x6f   : > { %p1110_p9 = pnand %p1109_p7, %p1248_p4 }
  0x70   : > { %p1115_p13 = por %p1114_p12, %p1113_p11 }
  0x71   : > { %p1111_p10 = pneg %p1110_p9 }
  0x73   : > { %p1116_p0 = pnand %p1115_p13, %p1111_p10 }
  0x75   : > { %1119 = shalt.err (!%p1116_p0)
}
  0x76   : > { %s1181_s6 = smov 64   ;;  %s1182_s7 = smov 4  }
  0x77   : > { %1028 = dma.vmem_to_hbm [thread:$0]  (%p1248_p4), %s1516_s8, 384, %s1514_s12, %s1520_s13, %s1181_s6, %s1181_s6, %s1182_s7  }
  0x78 PF: > { %p1035_p1 = scmp.ge.s32.totalorder %s1174_s20, 2  ;;  %s806_s9 = sand.u32 1, %s1154_s15  }
  0x79   : > { %s807_s11 = scalar_lea.sflag [#allocation4], %s806_s9 }
  0x7a   : > { %p1031_p2 = pnand %p1035_p1, %p1255_p8 }
  0x7c   : > { %p1032_p3 = pneg %p1031_p2 }
  0x7e   : > { %1149 = dma.done.wait (%p1032_p3), %s807_s11, 384  }
  0x7f   : > { %1151 = vsyncadd (%p1032_p3), %s807_s11, 4294966912  ;;  %s17_s20 = sadd.s32 1, %s1174_s20   ;;  %s1572_s15 = smov %s1158_s16 }
  0x80   : > { %p14_p5 = scmp.ge.s32.totalorder %s17_s20, 4   ;;  %s1573_s16 = smov %s1162_s17 }
  0x81   : > { %s1574_s17 = smov %s1261_s28  ;;  %s1575_s18 = smov %s1170_s19 }
  0x82   : > { %s1576_s19 = smov %s1578_s23  ;;  %16 = sbr.rel (!%p14_p5) target bundleno = 4 (0x4), region = 107 }
  0x87   :  { %812 = vsyncpa [#allocation4], 1 }
  0x88   :  { %814 = vsyncpa [#allocation4 + $0x1], 1 }

</bundles_post_ra>
